<compile_context>
chip_gen: v6e
topology: v6e:2x2x1
jax: 0.10.0
libtpu: 0.0.40
codegen_flags: <defaults>
</compile_context>

<pallas_src>
import functools
import math

import jax
import jax.numpy as jnp
from jax.experimental import pallas as pl
from jax.experimental.pallas import tpu as pltpu

LRELU_SLOPE = 0.2
BN_EPS = 1e-5            # nn.BatchNorm2d default eps


@functools.lru_cache(maxsize=None)
def _vmem_limit_bytes():
    """Per-generation scoped-VMEM limit (v7x: 64 MiB/TC; v5e/v6e: 128 MiB)."""
    try:
        cap = int(getattr(pltpu.get_tpu_info(), "vmem_capacity_bytes", 0) or 0)
    except Exception:
        cap = 0
    if cap <= 0:
        return 32 * 1024 * 1024          # conservative default, safe everywhere
    return min(int(cap * 0.55), 64 * 1024 * 1024)


_VMEM = pl.BlockSpec(memory_space=pltpu.MemorySpace.VMEM)


# ----------------------------- Pallas kernels -----------------------------

def _bn_act_gemm_kernel(*refs, fuse_bn, inv_m):
    """One fused layer step: y = (LeakyReLU(BN_prev(x)) if fuse_bn else x) @ W.

    x : (M, C_in)        raw (pre-BN) output of the previous layer, M = B*H*W
    W : (C_in, k*k*C_out) bf16 -- dual/scatter (de)conv weight, so the MXU never
                          multiplies inserted zeros and k*k*C_out is lane-dense.
    BN is the previous layer's BatchNorm2d in training mode: per-channel batch
    statistics over all M rows (== reduction over (N, H, W)), two-pass variance.
    """
    if fuse_bn:
        x_ref, gamma_ref, beta_ref, w_ref, o_ref = refs
        x = x_ref[...].astype(jnp.float32)
        mean = jnp.sum(x, axis=0, keepdims=True) * inv_m
        xc = x - mean
        var = jnp.sum(xc * xc, axis=0, keepdims=True) * inv_m    # biased, as torch
        x = gamma_ref[...] * (xc * jax.lax.rsqrt(var + BN_EPS)) + beta_ref[...]
        x = jnp.where(x > 0, x, LRELU_SLOPE * x)                 # LeakyReLU(0.2)
        lhs = x.astype(jnp.bfloat16)
    else:
        x_ref, w_ref, o_ref = refs
        lhs = x_ref[...].astype(jnp.bfloat16)
    o_ref[...] = jnp.dot(lhs, w_ref[...],
                         preferred_element_type=jnp.float32).astype(o_ref.dtype)


def _tanh_kernel(x_ref, o_ref):
    o_ref[...] = jnp.tanh(x_ref[...].astype(jnp.float32)).astype(o_ref.dtype)


# ----------------------------- pallas_call wrappers -----------------------------

def fused_prevbn_gemm(x_rows, w, gamma=None, beta=None):
    """[prev BN + prev LeakyReLU] + dual GEMM in one kernel (whole-array blocks).

    BN needs full-batch statistics, so all M rows stay in one VMEM block; every
    block here is tiny (<= a few MiB even at large batch for this architecture).
    """
    M, K = x_rows.shape
    N = w.shape[1]
    fuse_bn = gamma is not None
    args = (x_rows, gamma, beta, w) if fuse_bn else (x_rows, w)
    kernel = functools.partial(_bn_act_gemm_kernel, fuse_bn=fuse_bn, inv_m=1.0 / M)
    bytes_acc = M * K * x_rows.dtype.itemsize + K * N * 2 + M * N * 2 + 16 * K
    return pl.pallas_call(
        kernel,
        out_shape=jax.ShapeDtypeStruct((M, N), jnp.bfloat16),   # bf16 intermediates
        in_specs=[_VMEM] * len(args),
        out_specs=_VMEM,
        compiler_params=pltpu.CompilerParams(vmem_limit_bytes=_vmem_limit_bytes()),
        cost_estimate=pl.CostEstimate(flops=int(2 * M * K * N), transcendentals=0,
                                      bytes_accessed=int(bytes_acc)),
    )(*args)


def tanh_pallas(x):
    """Final nn.Tanh on a lane-dense (rows, 128) view, row-tiled + parallel."""
    shape = x.shape
    total = x.size
    x2 = x.reshape(total // 128, 128) if total % 128 == 0 else x.reshape(-1, shape[-1])
    M, N = x2.shape
    tile = next((t for t in (2048, 1024, 512, 256, 128, 64, 32, 16, 8)
                 if t <= M and M % t == 0), M)
    y = pl.pallas_call(
        _tanh_kernel,
        out_shape=jax.ShapeDtypeStruct((M, N), jnp.float32),
        grid_spec=pltpu.PrefetchScalarGridSpec(
            num_scalar_prefetch=0,
            grid=(M // tile,),
            in_specs=[pl.BlockSpec((tile, N), lambda i: (i, 0))],
            out_specs=pl.BlockSpec((tile, N), lambda i: (i, 0)),
        ),
        compiler_params=pltpu.CompilerParams(
            dimension_semantics=("parallel",),
            vmem_limit_bytes=_vmem_limit_bytes()),
        cost_estimate=pl.CostEstimate(flops=int(total), transcendentals=int(total),
                                      bytes_accessed=int(total * 6)),
    )(x2)
    return y.reshape(shape)


# ----------------------------- layout plumbing (plain JAX) -----------------------------

def _col2im(g, B, H, W, k, s, cout, crop, h_out, w_out):
    """Overlap-add of the dual-GEMM output (pure layout glue + adds).

    g: (B*H*W, k*k*cout).  canvas[b, s*i + a, s*j + b', :] += g[b, i, j, a, b', :]
    then crop to the (de)conv output window.  Accumulate in f32, store bf16.
    """
    g = g.astype(jnp.float32).reshape(B, H, W, k, k, cout)
    hc, wc = (H - 1) * s + k, (W - 1) * s + k
    canvas = jnp.zeros((B, hc, wc, cout), jnp.float32)
    for a in range(k):
        for b in range(k):
            canvas = canvas.at[:, a:a + s * (H - 1) + 1:s,
                                  b:b + s * (W - 1) + 1:s, :].add(g[:, :, :, a, b, :])
    return canvas[:, crop:crop + h_out, crop:crop + w_out, :].astype(jnp.bfloat16)


# ----------------------------- parameters -----------------------------

def _layer_cfgs(nz, nc, ngf, n_extra_layers_g):
    cfgs = [
        dict(deconv=True, cin=nz,      cout=ngf * 8, k=2, stride=1, pad=0, bn=True),
        dict(deconv=True, cin=ngf * 8, cout=ngf * 4, k=4, stride=2, pad=1, bn=True),
        dict(deconv=True, cin=ngf * 4, cout=ngf * 2, k=4, stride=2, pad=1, bn=True),
        dict(deconv=True, cin=ngf * 2, cout=ngf,     k=4, stride=2, pad=1, bn=True),
    ]
    for _ in range(n_extra_layers_g):
        cfgs.append(dict(deconv=False, cin=ngf, cout=ngf, k=3, stride=1, pad=1, bn=True))
    cfgs.append(dict(deconv=True, cin=ngf, cout=nc, k=4, stride=2, pad=1, bn=False))
    return cfgs


def init_params(key, nz, nc, ngf, n_extra_layers_g):
    """Random weights in PyTorch layout, pre-reshaped to the dual-GEMM layout
    (C_in, k*k*C_out), stored as bf16 (f32 accumulation happens in the kernel)."""
    cfgs = _layer_cfgs(nz, nc, ngf, n_extra_layers_g)
    params = []
    for cfg, kk in zip(cfgs, jax.random.split(key, len(cfgs))):
        cin, cout, K = cfg["cin"], cfg["cout"], cfg["k"]
        bound = 1.0 / math.sqrt(cin * K * K)
        if cfg["deconv"]:
            # torch ConvTranspose2d weight: (C_in, C_out, kh, kw).  The scatter
            # form uses it un-flipped: W[ci, (kh*k+kw)*C_out + co] = w[ci,co,kh,kw].
            wt = jax.random.uniform(kk, (cin, cout, K, K), jnp.float32, -bound, bound)
            wf = jnp.transpose(wt, (0, 2, 3, 1)).reshape(cin, K * K * cout)
        else:
            # torch Conv2d weight: (C_out, C_in, kh, kw).  Scatter form needs the
            # spatially flipped kernel: W[ci,(a*k+b)*C_out+co] = w[co,ci,K-1-a,K-1-b].
            wc = jax.random.uniform(kk, (cout, cin, K, K), jnp.float32, -bound, bound)
            wf = jnp.transpose(wc[:, :, ::-1, ::-1], (1, 2, 3, 0)).reshape(cin, K * K * cout)
        layer = dict(cfg)
        layer["w"] = wf.astype(jnp.bfloat16)
        if cfg["bn"]:
            layer["gamma"] = jnp.ones((1, cout), jnp.float32)
            layer["beta"] = jnp.zeros((1, cout), jnp.float32)
        params.append(layer)
    return params


# ----------------------------- forward -----------------------------

def generator_noll_forward(z, params):
    """z: (B, nz, 1, 1) (or (B, nz)).  Returns NCHW image like the PyTorch module.

    Per layer: ONE fused Pallas kernel ([prev BN + prev LeakyReLU] + dual GEMM),
    then a col2im overlap-add (layout glue).  Trailing Tanh is its own kernel.
    BatchNorm matches PyTorch train-mode; running stats are not tracked.
    """
    B = z.shape[0]
    x = z.reshape(B, 1, 1, -1).astype(jnp.bfloat16)        # NCHW (1x1) -> NHWC
    hh = ww = 1
    prev_gamma = prev_beta = None
    for layer in params:
        cin, cout, k = layer["cin"], layer["cout"], layer["k"]
        s, p = layer["stride"], layer["pad"]
        if layer["deconv"]:
            h_out, w_out = (hh - 1) * s - 2 * p + k, (ww - 1) * s - 2 * p + k
            crop = p
        else:
            h_out, w_out = (hh + 2 * p - k) // s + 1, (ww + 2 * p - k) // s + 1
            crop = k - 1 - p
        rows = x.reshape(B * hh * ww, cin)
        g = fused_prevbn_gemm(rows, layer["w"], prev_gamma, prev_beta)
        x = _col2im(g, B, hh, ww, k, s, cout, crop, h_out, w_out)
        hh, ww = h_out, w_out
        if layer["bn"]:
            prev_gamma, prev_beta = layer["gamma"], layer["beta"]
        else:
            prev_gamma = prev_beta = None
    img = tanh_pallas(x)                                   # final nn.Tanh
    return jnp.transpose(img, (0, 3, 1, 2))                # NHWC -> NCHW


# ----------------------------- demo -----------------------------

if __name__ == "__main__":
    nz, nc, ngf, n_extra_layers_g = 16, 3, 8, 1
    batch = 2

    key = jax.random.PRNGKey(0)
    kz, kp = jax.random.split(key)
    z = jax.random.normal(kz, (batch, nz, 1, 1), dtype=jnp.float32)
    params = init_params(kp, nz, nc, ngf, n_extra_layers_g)

    img = generator_noll_forward(z, params)
    img = jax.block_until_ready(img)

    # 1x1 input -> 2 -> 4 -> 8 -> 16 -> (extra layer, 16) -> 32
    assert img.shape == (batch, nc, 32, 32), img.shape
    assert img.dtype == jnp.float32
    assert bool(jnp.all(jnp.isfinite(img)))
    assert bool(jnp.all(jnp.abs(img) <= 1.0))   # tanh output range
    print("KERNEL_OK")
</pallas_src>

<mosaic_0001>
module attributes {stable_mosaic.version = 11 : i64} {
  func.func @_bn_act_gemm_kernel(%arg0: memref<2x16xbf16, #tpu.memory_space<vmem>>, %arg1: memref<16x256xbf16, #tpu.memory_space<vmem>>, %arg2: memref<2x256xbf16, #tpu.memory_space<vmem>>) attributes {dimension_semantics = [], scalar_prefetch = 0 : i64, scratch_operands = 0 : i64, tpu.core_type = #tpu.core_type<tc>} {
    %c0 = arith.constant 0 : index
    %c0_0 = arith.constant 0 : index
    %0 = vector.load %arg0[%c0, %c0_0] : memref<2x16xbf16, #tpu.memory_space<vmem>>, vector<2x16xbf16>
    %c0_1 = arith.constant 0 : index
    %c0_2 = arith.constant 0 : index
    %1 = vector.load %arg1[%c0_1, %c0_2] : memref<16x256xbf16, #tpu.memory_space<vmem>>, vector<16x256xbf16>
    %cst = arith.constant dense<0.000000e+00> : vector<2x256xf32>
    %2 = tpu.matmul %0, %1, %cst {dimension_numbers = #tpu.dot_dimension_numbers<[1], [0], [0], [1], [0, 0, 1, 1], [], []>} : vector<2x16xbf16>, vector<16x256xbf16>, vector<2x256xf32> -> vector<2x256xf32>
    %3 = arith.truncf %2 : vector<2x256xf32> to vector<2x256xbf16>
    %c0_3 = arith.constant 0 : index
    %c0_4 = arith.constant 0 : index
    %4 = vector.load %arg2[%c0_3, %c0_4] : memref<2x256xbf16, #tpu.memory_space<vmem>>, vector<2x256xbf16>
    tpu.vector_store %arg2[%c0_3, %c0_4], %3 {strides = array<i32>} : memref<2x256xbf16, #tpu.memory_space<vmem>>, vector<2x256xbf16>,
    return
  }
}

</mosaic_0001>

<bundles_post_ra>
// kernel: tpu_custom_call.1
= control target key start
LH: loop header
LB: loop body
LE: loop exit
PB: predicated region body
PF: predicated region fallthrough
CT: control target
= control target key end

     0   :  { %7 = vsyncpa [#allocation3], 0  ;;  %s246_s0 = inlined_call_operand.hbm [shape: bf16[2,16], index: 0, kind: input, shape index: {}]   ;;  %s247_s1 = inlined_call_operand.hbm [shape: bf16[16,256], index: 1, kind: input, shape index: {}]   ;;  %s248_s2 = inlined_call_operand.hbm [shape: bf16[2,256], index: 2, kind: output, shape index: {}]  }
   0x1   :  { %8 = vsyncpa [#allocation6], 0 }
   0x2   :  { %9 = vsyncpa [#allocation4], 0  ;;  %s215_s9 = smov [#allocation2]   ;;  %s216_s11 = smov [#allocation5]  }
   0x3   :  { %s16_s10 = sshll.u32 %s215_s9, 4  ;;  %s25_s12 = sshll.u32 %s216_s11, 4  ;;  %s17_s10 = int_to_ptr.vmem [resolvable:$true] %s16_s10  ;;  %s26_s12 = int_to_ptr.vmem [resolvable:$true] %s25_s12 }
   0x4   :  { %s157_s13 = scalar_lea.vmem %s17_s10, 16  ;;  %s161_s14 = scalar_lea.vmem %s17_s10, 32 }
   0x5   :  { %p158_p0 = scmp.ne.s32.totalorder %s17_s10, %s157_s13  ;;  %p162_p1 = scmp.lt.s32.totalorder %s17_s10, %s17_s10 }
   0x6   :  { %p163_p2 = scmp.lt.s32.totalorder %s161_s14, %s157_s13 }
   0x8   :  { %p164_p3 = por %p163_p2, %p162_p1 }
   0xa   :  { %p165_p4 = pnand %p164_p3, %p158_p0 }
   0xc   :  { %168 = shalt.err (!%p165_p4)
}
   0xd   :  { %19 = dma.hbm_to_vmem [thread:$0]  %s246_s0, 16, %s17_s10, [#allocation3]  }
   0xe   :  { %s177_s17 = scalar_lea.vmem %s26_s12, 256  ;;  %p182_p6 = scmp.lt.s32.totalorder %s26_s12, %s26_s12 }
   0xf   :  { %p178_p5 = scmp.ne.s32.totalorder %s26_s12, %s177_s17  ;;  %p183_p7 = scmp.lt.s32.totalorder %s177_s17, %s177_s17 }
  0x11   :  { %p184_p8 = por %p183_p7, %p182_p6 }
  0x13   :  { %p185_p9 = pnand %p184_p8, %p178_p5 }
  0x15   :  { %188 = shalt.err (!%p185_p9)
}
  0x16   :  { %s217_s18 = smov 128   ;;  %s218_s19 = smov 8  }
  0x17   :  { %31 = dma.hbm_to_vmem [thread:$0]  %s247_s1, 256, %s26_s12, [#allocation6], %s217_s18, %s217_s18, %s218_s19  }
  0x18   :  { %209 = dma.done.wait [#allocation3], 16  }
  0x19   :  { %210 = vsyncadd [#allocation3], 4294967280 }
  0x1a   :  { %211 = dma.done.wait [#allocation6], 256  }
  0x1b   :  { %212 = vsyncadd [#allocation6], 4294967040  ;;  %v219_v0 = vmov 0   ;;  %v146_v1 = vld [vmem:[#allocation5 + $0x4] ss:$8 sps:$4 sm:$0xff]   ;;  %vm52_vm0 = vcmask 130048   ;;  %v105_v6 = vlaneseq }
  0x1c   :  { %88 = vmatprep.mubr.bf16.mxu0 %v219_v0  ;;  %v148_v2 = vld [vmem:[#allocation5] ss:$8 sps:$4 sm:$0xff]   ;;  %70 = vmatprep.subr.bf16.mxu0 %v146_v1  ;;  %v39_v3 = vld [vmem:[#allocation2] sm:$0x1]  ;;  %v220_v4 = vmov 1966171168  }
  0x1d   :  { %71 = vmatpush1.bf16.msra.mxu0 %v148_v2  ;;  %v103_v5 = vunpack.c.l.s4 %v220_v4  ;;  %v106_v8 = vshrl.u32 %v105_v6, 7  ;;  %s221_s0 = smov [#allocation7]  }
  0x1e   :  { %s124_s1 = sshll.u32 %s221_s0, 4  ;;  %s125_s1 = int_to_ptr.vmem [resolvable:$true] %s124_s1 }
  0x1f   :  { %v104_v7 = vunpack.c.0.s8 %v103_v5  ;;  %s189_s22 = scalar_lea.vmem %s125_s1, 32  ;;  %p194_p11 = scmp.lt.s32.totalorder %s125_s1, %s125_s1 }
  0x20   :  { %136 = vmatmul.mubr.msk.bf16.vlgmr.msra.gmra.mxu0 %vm52_vm0, %v39_v3  ;;  %p190_p10 = scmp.ne.s32.totalorder %s125_s1, %s189_s22  ;;  %p195_p12 = scmp.lt.s32.totalorder %s189_s22, %s189_s22 }
  0x21   :  { %v107_v10 = vsub.s32 %v104_v7, %v106_v8 }
  0x22   :  { %p196_p13 = por %p195_p12, %p194_p11 }
  0x24   :  { %p197_p0 = pnand %p196_p13, %p190_p10 }
  0xe0   :  { %v90_v9 = vpop.f32.mrf.mxu0 }
  0xe2   :  { %v92_v11 = vpop.f32.mrf.mxu0 }
  0xe3   :  { %v137_v12 = vpack.c.bf16 %v92_v11, %v90_v9 }
  0xe4   :  { %v94_v13 = vpop.f32.mrf.mxu0 }
  0xe5   :  { %v108_v14 = vrot.slane %v137_v12, %v107_v10 }
  0xe6   :  { %v95_v15 = vpop.f32.mrf.mxu0 }
  0xe7   :  { %138 = vst.sshfl [vmem:[#allocation7] sm:$0x5 pattern:$0x73625140] %v108_v14 }
  0xe8   :  { %200 = shalt.err (!%p197_p0)
}
  0xe9   :  { %127 = dma.vmem_to_hbm [thread:$0]  %s125_s1, 32, %s248_s2, [#allocation4]  }
  0xea   :  { %213 = dma.done.wait [#allocation4], 32  }
  0xeb   :  { %214 = vsyncadd [#allocation4], 4294967264 }
  0xec   :  { %131 = vsyncpa [#allocation3], 1 }
  0xed   :  { %132 = vsyncpa [#allocation6], 1 }
  0xee   :  { %133 = vsyncpa [#allocation4], 1 }

</bundles_post_ra>
